<compile_context>
chip_gen: v6e
topology: v6e:2x2x1
jax: 0.10.0
libtpu: 0.0.40
codegen_flags: <defaults>
</compile_context>

<pallas_src>
import math
import functools

import jax
import jax.numpy as jnp
from jax import lax
from jax.experimental import pallas as pl
from jax.experimental.pallas import tpu as pltpu


_LANES = 512           # lane width of the packed 2-D layout (multiple of 256)
_MAX_TILE_ROWS = 256   # 256 x 512 f32 = 512 KiB per operand block (fits all gens)


def _round_up(a, b):
    return ((a + b - 1) // b) * b


# ----------------------- portable counter-based PRNG (in-kernel) -----------------------

def _mix32(x):
    # lowbias32 integer finalizer — uint32 in, uint32 out.
    x = x ^ (x >> jnp.uint32(16))
    x = x * jnp.uint32(0x21F0AAAD)
    x = x ^ (x >> jnp.uint32(15))
    x = x * jnp.uint32(0x735A2D97)
    x = x ^ (x >> jnp.uint32(15))
    return x


def _uniform01(counter, key):
    """Stateless U ~ Uniform(0,1) (open interval) from a uint32 counter + key."""
    x = _mix32(counter ^ key)
    x = _mix32(x ^ (counter * jnp.uint32(0x85EBCA6B)))
    v = (x >> jnp.uint32(8)).astype(jnp.int32).astype(jnp.float32)   # 24 bits, exact
    return (v + jnp.float32(0.5)) * jnp.float32(1.0 / (1 << 24))


def _std_normal(counter, key1, key2):
    """Standard normal via Box-Muller (one draw per element)."""
    u1 = _uniform01(counter, key1)
    u2 = _uniform01(counter, key2)
    r = jnp.sqrt(jnp.float32(-2.0) * jnp.log(u1))
    return r * jnp.cos(jnp.float32(2.0 * math.pi) * u2)


def _global_index(block_shape, n_cols):
    """uint32 global flat element index for every element of the current tile."""
    tm, tn = block_shape
    rows = lax.broadcasted_iota(jnp.int32, (tm, tn), 0).astype(jnp.uint32)
    cols = lax.broadcasted_iota(jnp.int32, (tm, tn), 1).astype(jnp.uint32)
    row0 = (pl.program_id(0) * tm).astype(jnp.uint32)
    return (row0 + rows) * jnp.uint32(n_cols) + cols


# ----------------------------------- kernels -------------------------------------------

def _mean_sq_kernel(count, x_ref, o_ref):
    # Tiled reduction: avg_pwr = sum(x**2) / count   (count = true, un-padded size).
    @pl.when(pl.program_id(0) == 0)
    def _():
        o_ref[0] = jnp.float32(0.0)
    x = x_ref[...]
    o_ref[0] += jnp.sum(x * x)
    @pl.when(pl.program_id(0) == pl.num_programs(0) - 1)
    def _():
        o_ref[0] = o_ref[0] * jnp.float32(1.0 / count)


def _awgn_kernel(n_cols, x_ref, scale_ref, seed_ref, o_ref):
    a = scale_ref[0]                       # signal scale
    b = scale_ref[1]                       # noise scale (includes sigma)
    seed_u = seed_ref[0].astype(jnp.uint32)
    key1 = seed_u + jnp.uint32(0x3C6EF372)
    key2 = seed_u + jnp.uint32(0xBB67AE85)
    idx = _global_index(x_ref.shape, n_cols)
    z = _std_normal(idx, key1, key2)       # i.i.d. N(0,1) on every (real|imag) slot
    o_ref[...] = x_ref[...] * a + z * b


def _rayleigh_kernel(n_cols, x_ref, scale_ref, seed_ref, o_ref, h_ref):
    a = scale_ref[0]
    b = scale_ref[1]
    seed_u = seed_ref[0].astype(jnp.uint32)
    key1 = seed_u + jnp.uint32(0x3C6EF372)
    key2 = seed_u + jnp.uint32(0xBB67AE85)
    keyh = seed_u + jnp.uint32(0x1B873593)

    idx = _global_index(x_ref.shape, n_cols)
    z = _std_normal(idx, key1, key2)                       # complex AWGN, interleaved
    # h ~ Rayleigh(1/sqrt(2)) == sqrt(-ln U). The pair counter (idx >> 1) is identical
    # for the real/imag lanes of one complex symbol, so both get the same h value
    # without any de-interleave / cross-lane data movement.
    u_h = _uniform01(idx >> jnp.uint32(1), keyh)
    h_full = jnp.sqrt(-jnp.log(u_h))
    o_ref[...] = x_ref[...] * (a * h_full) + z * b

    # Channel response output: one value per complex symbol (half lane width),
    # recomputed from the same pair counters -> bit-identical to the values above.
    tm, tn_h = h_ref.shape
    rows = lax.broadcasted_iota(jnp.int32, (tm, tn_h), 0).astype(jnp.uint32)
    cols = lax.broadcasted_iota(jnp.int32, (tm, tn_h), 1).astype(jnp.uint32)
    row0 = (pl.program_id(0) * tm).astype(jnp.uint32)
    pair = (row0 + rows) * jnp.uint32(n_cols // 2) + cols
    h_ref[...] = jnp.sqrt(-jnp.log(_uniform01(pair, keyh)))


# ----------------------------------- wrapper --------------------------------------------

_SMEM_SPEC = pl.BlockSpec(memory_space=pltpu.MemorySpace.SMEM)


def _pack_2d(x):
    """Flatten to a lane/sublane-dense (M, _LANES) f32 slab, zero-padded at the end."""
    T = 1
    for d in x.shape:
        T *= d
    N = _LANES
    m_needed = -(-T // N)
    if m_needed <= _MAX_TILE_ROWS:
        TM = max(8, _round_up(m_needed, 8))
        M = TM
    else:
        TM = _MAX_TILE_ROWS
        M = _round_up(m_needed, TM)
    T_pad = M * N
    flat = jnp.ravel(x).astype(jnp.float32)
    if T_pad != T:
        flat = jnp.pad(flat, (0, T_pad - T))
    return flat.reshape(M, N), T, TM


def _mean_power(x2d, count, tm):
    M, N = x2d.shape
    return pl.pallas_call(
        functools.partial(_mean_sq_kernel, count),
        out_shape=jax.ShapeDtypeStruct((1,), jnp.float32),
        grid=(M // tm,),
        in_specs=[pl.BlockSpec((tm, N), lambda i: (i, 0))],
        out_specs=_SMEM_SPEC,
        compiler_params=pltpu.CompilerParams(dimension_semantics=("arbitrary",)),
    )(x2d)


def channel_forward(x, *, chan_type="awgn", snr_db=10.0, power=1.0,
                    avg_pwr=None, rescale=True, seed=0):
    """JAX/Pallas equivalent of Channel.forward for chan_type in {'awgn','rayleigh'}."""
    x = jnp.asarray(x, dtype=jnp.float32)
    B = x.shape[0]
    n = 1
    for d in x.shape[1:]:
        n *= d
    if n % 2 != 0:
        raise ValueError("per-sample feature size must be even (real/imag interleave)")

    x2d, T, TM = _pack_2d(x)
    M, N = x2d.shape

    if avg_pwr is None:
        avg = _mean_power(x2d, T, TM)[0]      # zero padding does not change the sum
    else:
        avg = jnp.float32(avg_pwr)

    # Fold rescale / sigma / power into two scalars:
    #   y = a * x * [h] + b * z    with z ~ N(0,1), h ~ Rayleigh(1/sqrt(2))
    sigma = math.sqrt(1.0 / (2.0 * 10.0 ** (snr_db / 10.0)))
    sqrt_2p = jnp.sqrt(2.0 * avg)
    if rescale:
        a = jnp.float32(math.sqrt(power))
        b = jnp.float32(sigma) * sqrt_2p
    else:
        a = jnp.float32(math.sqrt(power)) / sqrt_2p
        b = jnp.float32(sigma)
    scale_arr = jnp.stack([jnp.asarray(a, jnp.float32), jnp.asarray(b, jnp.float32)])
    seed_arr = jnp.asarray([seed], dtype=jnp.int32)
    channel_usage = B * (n // 2)

    grid = (M // TM,)
    ew_params = pltpu.CompilerParams(dimension_semantics=("parallel",))

    if chan_type == "awgn":
        y2d = pl.pallas_call(
            functools.partial(_awgn_kernel, N),
            out_shape=jax.ShapeDtypeStruct((M, N), jnp.float32),
            grid=grid,
            in_specs=[pl.BlockSpec((TM, N), lambda i: (i, 0)), _SMEM_SPEC, _SMEM_SPEC],
            out_specs=pl.BlockSpec((TM, N), lambda i: (i, 0)),
            compiler_params=ew_params,
        )(x2d, scale_arr, seed_arr)
        y = jnp.ravel(y2d)[:T].reshape(x.shape)
        return y, channel_usage

    elif chan_type == "rayleigh":
        y2d, h2d = pl.pallas_call(
            functools.partial(_rayleigh_kernel, N),
            out_shape=(jax.ShapeDtypeStruct((M, N), jnp.float32),
                       jax.ShapeDtypeStruct((M, N // 2), jnp.float32)),
            grid=grid,
            in_specs=[pl.BlockSpec((TM, N), lambda i: (i, 0)), _SMEM_SPEC, _SMEM_SPEC],
            out_specs=(pl.BlockSpec((TM, N), lambda i: (i, 0)),
                       pl.BlockSpec((TM, N // 2), lambda i: (i, 0))),
            compiler_params=ew_params,
        )(x2d, scale_arr, seed_arr)
        y = jnp.ravel(y2d)[:T].reshape(x.shape)
        h = jnp.ravel(h2d)[: T // 2].reshape(B, n // 2)   # channel response, un-rescaled
        return y, h, channel_usage

    else:
        # TODO(synk): the 'noiseless' branch of the torch module falls through forward()
        # without producing a return value; not implemented here.
        raise ValueError(f"unsupported channel type: {chan_type}")


if __name__ == "__main__":
    key = jax.random.PRNGKey(0)
    x = jax.random.normal(key, (2, 4, 16, 16), dtype=jnp.float32)   # NCHW

    # ---- AWGN channel, SNR = 10 dB --------------------------------------------------
    rx, usage = channel_forward(x, chan_type="awgn", snr_db=10.0, seed=0)
    rx = jax.block_until_ready(rx)
    assert rx.shape == x.shape
    assert usage == 2 * (4 * 16 * 16 // 2)
    assert bool(jnp.all(jnp.isfinite(rx)))
    # With rescale=True and power=1:  rx = x + z * sigma * sqrt(2*avg_pwr)
    sigma = math.sqrt(1.0 / (2.0 * 10.0 ** (10.0 / 10.0)))
    avg_np = float(jnp.mean(x ** 2))
    est_std = float(jnp.std(rx - x))
    exp_std = sigma * math.sqrt(2.0 * avg_np)
    assert abs(est_std - exp_std) / exp_std < 0.2, (est_std, exp_std)

    # ---- Rayleigh channel, SNR = 10 dB ----------------------------------------------
    rx_r, h, usage_r = channel_forward(x, chan_type="rayleigh", snr_db=10.0, seed=1)
    jax.block_until_ready((rx_r, h))
    assert rx_r.shape == x.shape
    assert h.shape == (2, 4 * 16 * 16 // 2)
    assert usage_r == usage
    assert bool(jnp.all(jnp.isfinite(rx_r))) and bool(jnp.all(h > 0))
    # E[h] for Rayleigh(1/sqrt(2)) is sqrt(pi)/2 ~= 0.886
    assert abs(float(jnp.mean(h)) - math.sqrt(math.pi) / 2.0) < 0.15

    print("KERNEL_OK")
</pallas_src>

<mosaic_0001>
module attributes {stable_mosaic.version = 11 : i64} {
  func.func @_mean_sq_kernel(%arg0: i32, %arg1: memref<8x512xf32, #tpu.memory_space<vmem>>, %arg2: memref<1xf32, #tpu.memory_space<smem>>) attributes {dimension_semantics = [#tpu.dimension_semantics<arbitrary>], iteration_bounds = array<i64: 1>, scalar_prefetch = 0 : i64, scratch_operands = 0 : i64, tpu.core_type = #tpu.core_type<tc>, window_params = [{transform_indices = @transform_0, window_bounds = array<i64: 8, 512>}, {transform_indices = @transform_1, window_bounds = array<i64: 1>}]} {
    %c0_i32 = arith.constant 0 : i32
    %0 = arith.cmpi eq, %arg0, %c0_i32 : i32
    %1 = arith.extui %0 : i1 to i32
    %c0_i32_0 = arith.constant 0 : i32
    %2 = arith.cmpi ne, %1, %c0_i32_0 : i32
    scf.if %2 {
      %cst_6 = arith.constant 0.000000e+00 : f32
      %c0_7 = arith.constant 0 : index
      %15 = memref.load %arg2[%c0_7] : memref<1xf32, #tpu.memory_space<smem>>
      memref.store %cst_6, %arg2[%c0_7] : memref<1xf32, #tpu.memory_space<smem>>
    } else {
    }
    %c0 = arith.constant 0 : index
    %c0_1 = arith.constant 0 : index
    %3 = vector.load %arg1[%c0, %c0_1] : memref<8x512xf32, #tpu.memory_space<vmem>>, vector<8x512xf32>
    %c0_2 = arith.constant 0 : index
    %4 = memref.load %arg2[%c0_2] : memref<1xf32, #tpu.memory_space<smem>>
    %5 = arith.mulf %3, %3 : vector<8x512xf32>
    %6 = vector.shape_cast %5 : vector<8x512xf32> to vector<1x8x512xf32>
    %cst = arith.constant dense<0.000000e+00> : vector<1xf32>
    %7 = vector.multi_reduction <add>, %6, %cst [1, 2] : vector<1x8x512xf32> to vector<1xf32>
    %8 = vector.shape_cast %7 : vector<1xf32> to vector<1x1x1xf32>
    %9 = vector.extract %8[0, 0, 0] : f32 from vector<1x1x1xf32>
    %10 = arith.addf %4, %9 : f32
    %c0_3 = arith.constant 0 : index
    %11 = memref.load %arg2[%c0_3] : memref<1xf32, #tpu.memory_space<smem>>
    memref.store %10, %arg2[%c0_3] : memref<1xf32, #tpu.memory_space<smem>>
    %c0_i32_4 = arith.constant 0 : i32
    %12 = arith.cmpi eq, %arg0, %c0_i32_4 : i32
    %13 = arith.extui %12 : i1 to i32
    %c0_i32_5 = arith.constant 0 : i32
    %14 = arith.cmpi ne, %13, %c0_i32_5 : i32
    scf.if %14 {
      %c0_6 = arith.constant 0 : index
      %15 = memref.load %arg2[%c0_6] : memref<1xf32, #tpu.memory_space<smem>>
      %cst_7 = arith.constant 4.8828125E-4 : f32
      %16 = arith.mulf %15, %cst_7 : f32
      %c0_8 = arith.constant 0 : index
      %17 = memref.load %arg2[%c0_8] : memref<1xf32, #tpu.memory_space<smem>>
      memref.store %16, %arg2[%c0_8] : memref<1xf32, #tpu.memory_space<smem>>
    } else {
    }
    return
  }
  func.func @transform_0(%arg0: i32) -> (i32, i32) {
    %c0_i32 = arith.constant 0 : i32
    %c0_i32_0 = arith.constant 0 : i32
    return %arg0, %c0_i32 : i32, i32
  }
  func.func @transform_1(%arg0: i32) -> i32 {
    %c0_i32 = arith.constant 0 : i32
    %c0_i32_0 = arith.constant 0 : i32
    return %c0_i32 : i32
  }
}

</mosaic_0001>

<bundles_post_ra>
// kernel: tpu_custom_call.1
= control target key start
LH: loop header
LB: loop body
LE: loop exit
PB: predicated region body
PF: predicated region fallthrough
CT: control target
= control target key end

     0   :  { %6 = vsyncpa [#allocation3], 0  ;;  %s126_s0 = inlined_call_operand.hbm [shape: f32[8,512], index: 0, kind: input, shape index: {}]   ;;  %s127_s1 = inlined_call_operand.hbm [shape: f32[1], index: 1, kind: output, shape index: {}]  }
   0x1   :  { %7 = vsyncpa [#allocation4], 0  ;;  %s108_s6 = smov [#allocation2]  }
   0x2   :  { %s14_s7 = sshll.u32 %s108_s6, 4  ;;  %s15_s7 = int_to_ptr.vmem [resolvable:$true] %s14_s7 }
   0x3   :  { %s84_s8 = scalar_lea.vmem %s15_s7, 512  ;;  %p89_p1 = scmp.lt.s32.totalorder %s15_s7, %s15_s7 }
   0x4   :  { %p85_p0 = scmp.ne.s32.totalorder %s15_s7, %s84_s8  ;;  %p90_p2 = scmp.lt.s32.totalorder %s84_s8, %s84_s8 }
   0x6   :  { %p91_p3 = por %p90_p2, %p89_p1 }
   0x8   :  { %p92_p4 = pnand %p91_p3, %p85_p0 }
   0xa   :  { %95 = shalt.err (!%p92_p4)
}
   0xb   :  { %17 = dma.hbm_to_vmem [thread:$0]  %s126_s0, 512, %s15_s7, [#allocation3]  }
   0xc   :  { %104 = dma.done.wait [#allocation3], 512  }
   0xd   :  { %105 = vsyncadd [#allocation3], 4294966784  ;;  %v27_v0 = vld [vmem:[#allocation2] sm:$0xff]  ;;  %v28_v1 = vld [vmem:[#allocation2 + $0x8] sm:$0xff]  ;;  %s109_s12 = smov [#allocation5]  }
   0xe   :  { %v29_v2 = vld [vmem:[#allocation2 + $0x10] sm:$0xff]  ;;  %v30_v3 = vld [vmem:[#allocation2 + $0x18] sm:$0xff]  ;;  %v32_v4 = vmul.f32 %v27_v0, %v27_v0  ;;  %v33_v5 = vmul.f32 %v28_v1, %v28_v1 }
   0xf   :  { %v34_v6 = vmul.f32 %v29_v2, %v29_v2  ;;  %v35_v7 = vmul.f32 %v30_v3, %v30_v3 }
  0x10   :  { %v36_v8 = vadd.f32 %v33_v5, %v32_v4 }
  0x12   :  { %v37_v9 = vadd.f32 %v36_v8, %v34_v6 }
  0x14   :  { %v38_v10 = vadd.f32 %v37_v9, %v35_v7 }
  0x16   :  { %39 = vadd.xlane.f32.xlu0 %v38_v10 }
  0x9f   :  { %v40_v11 = vpop.xlane.xlu0 %39 }
  0xa0   :  { %v41_v12 = vrot.slane %v40_v11, 4 }
  0xa2   :  { %v42_v13 = vadd.f32 %v41_v12, %v40_v11 }
  0xa4   :  { %v43_v14 = vrot.slane %v42_v13, 2 }
  0xa6   :  { %v44_v15 = vadd.f32 %v43_v14, %v42_v13 }
  0xa8   :  { %v45_v16 = vrot.slane %v44_v15, 1 }
  0xaa   :  { %v46_v17 = vadd.f32 %v45_v16, %v44_v15 }
  0xac   :  { %71 = vpush %v46_v17 }
  0xdd   :  { %s72_s0 = spop %71 }
  0xde   :  { %s55_s11 = smul.f32 0.00048828125, %s72_s0 }
  0xe0   :  { %56 = sst [smem:[#allocation5]] %s55_s11 }
  0xe1   :  { %64 = dma.smem_to_hbm %s109_s12, 16, %s127_s1, [#allocation4]  }
  0xe2   :  { %106 = dma.done.wait [#allocation4], 16  }
  0xe3   :  { %107 = vsyncadd [#allocation4], 4294967280 }
  0xe4   :  { %68 = sfence }
  0xe5   :  { %69 = vsyncpa [#allocation3], 1 }
  0xe6   :  { %70 = vsyncpa [#allocation4], 1 }

</bundles_post_ra>
